<compile_context>
chip_gen: v7x
topology: tpu7x:2x2x1
jax: 0.10.0
libtpu: 0.0.40
codegen_flags: <defaults>
</compile_context>

<pallas_src>
import functools

import jax
import jax.numpy as jnp
from jax.experimental import pallas as pl
from jax.experimental.pallas import tpu as pltpu


def _attention_sum_kernel(x_ref, o_ref, *acc_scratch, inv_hw, inv_c):
    """x_ref: (tB, tC, HW) input tile.

    o_ref: (tB, HW) output block, resident across the C grid axis (its index_map
    ignores c). When the output dtype is float32 it doubles as the accumulator;
    otherwise acc_scratch[0] is a persistent f32 VMEM accumulator.
    """
    acc_ref = acc_scratch[0] if acc_scratch else o_ref
    c_idx = pl.program_id(1)

    @pl.when(c_idx == 0)
    def _():
        acc_ref[...] = jnp.zeros_like(acc_ref)

    x = x_ref[...]  # native dtype — no full-tile f32 copy
    # AdaptiveAvgPool2d((1,1)): per-(b,c) mean over the FULL spatial extent
    # (spatial axis never tiled -> single-pass mean is exact). 1/HW is a
    # compile-time constant multiply.
    chn_mean = jnp.sum(x, axis=-1, keepdims=True, dtype=jnp.float32) * inv_hw
    chn_weight = jax.nn.sigmoid(chn_mean).astype(x.dtype)  # (tB, tC, 1), tiny EUP work
    # Weighted partial channel-sum with f32 accumulation. The broadcasted product
    # stays in the input dtype (no tile-sized f32 temporary); the kernel is
    # HBM-bound, so the VPU mul+reduce is hidden under the DMA.
    partial = jnp.sum(x * chn_weight, axis=1, dtype=jnp.float32)  # (tB, HW)
    acc_ref[...] += partial.astype(acc_ref.dtype)

    @pl.when(c_idx == pl.num_programs(1) - 1)
    def _():
        # torch.mean over channels: fold 1/C in at finalize.
        o_ref[...] = (acc_ref[...] * inv_c).astype(o_ref.dtype)


def _sublane(itemsize):
    """Sublane packing multiple for a dtype: 8 (4B), 16 (2B), 32 (1B)."""
    return max(8, 32 // itemsize)


def _default_vmem_limit_bytes():
    """Per-generation VMEM limit: 3/4 of physical (48 MiB v7x, 96 MiB v5e/v6e)."""
    cap = None
    try:
        info = pltpu.get_tpu_info()
        cap = int(getattr(info, "vmem_capacity_bytes", 0)) or None
    except Exception:
        cap = None
    if cap is None:
        cap = 64 * 1024 * 1024  # conservative floor: v7x per-TC VMEM
    return (cap * 3) // 4


def _pick_tiles(B, C, HW, in_itemsize, out_itemsize, use_scratch,
                budget_bytes, max_input_block_bytes):
    """Pick (tB, tC) satisfying Mosaic block constraints and the VMEM budget.

    Output block (tB, HW):     tB == B or tB % out_sublane == 0.
    Input  block (tB, tC, HW): tC == C or tC % in_sublane  == 0.
    HW always equals the full array dim (spatial is never tiled).
    """
    in_sub = _sublane(in_itemsize)
    out_sub = _sublane(out_itemsize)

    tb_all = [d for d in range(1, B + 1)
              if B % d == 0 and (d == B or d % out_sub == 0)]
    tc_all = [d for d in range(C, 0, -1)
              if C % d == 0 and (d == C or d % in_sub == 0)]
    # Guarantee >= 2 steps on the "parallel" batch axis whenever legally possible,
    # so v7x's two TensorCores both get work (free on single-TC v5e/v6e).
    tb_opts = [d for d in tb_all if d <= B // 2] or tb_all

    def footprint(tB, tC):
        in_blk = tB * tC * HW * in_itemsize
        f = 2 * in_blk                     # double-buffered input block
        f += in_blk                        # elementwise product temporary (native dtype)
        f += 2 * tB * HW * out_itemsize    # double-buffered output block
        if use_scratch:
            f += tB * HW * 4               # persistent f32 accumulator
        return f

    best = None
    for tB in tb_opts:
        for tC in tc_all:                  # descending -> first fit is largest tC
            if (tB * tC * HW * in_itemsize <= max_input_block_bytes
                    and footprint(tB, tC) <= budget_bytes):
                # Maximize tile area (fewest grid steps); grow tC before tB.
                if best is None or (tB * tC, tC) > (best[0] * best[1], best[1]):
                    best = (tB, tC)
                break
    if best is None:
        # TODO(synk): add an HW-tiled two-pass fallback (pass 1: per-(b,c) channel
        # means; pass 2: weighted spatial accumulate) for very large spatial maps.
        raise ValueError(
            "AttentionSum: even the smallest legal tile "
            f"({min(tb_all)}, {min(tc_all)}, {HW}) exceeds the VMEM budget "
            f"({budget_bytes} B, max input block {max_input_block_bytes} B).")
    return best


def attention_sum(x, *, vmem_limit_bytes=None,
                  max_input_block_bytes=16 * 1024 * 1024):
    """x: (B, C, H, W) -> (B, H, W), matching PyTorch AttentionSum.forward."""
    B, C, H, W = x.shape
    HW = H * W
    x2 = x.reshape(B, C, HW)  # lane-dense layout: H*W on the lane axis

    out_dtype = x.dtype
    use_scratch = out_dtype != jnp.float32   # f32 output accumulates in-place

    if vmem_limit_bytes is None:
        vmem_limit_bytes = _default_vmem_limit_bytes()
    # Leave headroom inside the limit for Mosaic internal scratch.
    budget_bytes = max(vmem_limit_bytes - 4 * 1024 * 1024, vmem_limit_bytes // 2)

    tB, tC = _pick_tiles(
        B, C, HW,
        jnp.dtype(x.dtype).itemsize, jnp.dtype(out_dtype).itemsize,
        use_scratch, budget_bytes, max_input_block_bytes)

    kernel = functools.partial(
        _attention_sum_kernel, inv_hw=1.0 / HW, inv_c=1.0 / C)

    scratch_shapes = [pltpu.VMEM((tB, HW), jnp.float32)] if use_scratch else []

    out2 = pl.pallas_call(
        kernel,
        out_shape=jax.ShapeDtypeStruct((B, HW), out_dtype),
        grid_spec=pltpu.PrefetchScalarGridSpec(
            num_scalar_prefetch=0,
            grid=(B // tB, C // tC),
            in_specs=[pl.BlockSpec((tB, tC, HW), lambda b, c: (b, c, 0))],
            out_specs=pl.BlockSpec((tB, HW), lambda b, c: (b, 0)),
            scratch_shapes=scratch_shapes,
        ),
        compiler_params=pltpu.CompilerParams(
            # Batch axis parallel (v7x dual-TC sharding); channel axis is the
            # accumulation axis so it must be arbitrary.
            dimension_semantics=("parallel", "arbitrary"),
            vmem_limit_bytes=vmem_limit_bytes,
        ),
    )(x2)
    return out2.reshape(B, H, W)


def attention_sum_ref(x):
    """Pure-JAX reference mirroring the PyTorch module."""
    chn_weight = jnp.mean(x, axis=(2, 3), keepdims=True)
    chn_weight = jax.nn.sigmoid(chn_weight)
    return jnp.mean(x * chn_weight, axis=1)


if __name__ == "__main__":
    key = jax.random.PRNGKey(0)

    # Primary check: small slab at the shape implied by the module's forward.
    B, C, H, W = 2, 4, 16, 16
    x = jax.random.normal(key, (B, C, H, W), dtype=jnp.float32)
    out = jax.block_until_ready(attention_sum(x))
    ref = attention_sum_ref(x)
    assert out.shape == (B, H, W), out.shape
    assert jnp.allclose(out, ref, atol=1e-5, rtol=1e-5), "mismatch vs reference"

    # Tiled-C accumulator path: force >1 channel grid step via a tiny block cap.
    B2, C2, H2, W2 = 2, 16, 16, 16
    x2 = jax.random.normal(jax.random.PRNGKey(0), (B2, C2, H2, W2), jnp.float32)
    out2 = jax.block_until_ready(
        attention_sum(x2, max_input_block_bytes=2 * 8 * H2 * W2 * 4))
    ref2 = attention_sum_ref(x2)
    assert out2.shape == (B2, H2, W2), out2.shape
    assert jnp.allclose(out2, ref2, atol=1e-5, rtol=1e-5), "mismatch (tiled C path)"

    # Non-multiple-of-128 spatial extent (lane-masking path for the full-dim block).
    B3, C3, H3, W3 = 2, 4, 13, 13
    x3 = jax.random.normal(jax.random.PRNGKey(0), (B3, C3, H3, W3), jnp.float32)
    out3 = jax.block_until_ready(attention_sum(x3))
    ref3 = attention_sum_ref(x3)
    assert out3.shape == (B3, H3, W3), out3.shape
    assert jnp.allclose(out3, ref3, atol=1e-5, rtol=1e-5), "mismatch (HW=169 path)"

    print("KERNEL_OK")
</pallas_src>

<mosaic_0001>
module attributes {stable_mosaic.version = 11 : i64} {
  func.func @_attention_sum_kernel(%arg0: i32, %arg1: i32, %arg2: memref<2x4x256xf32, #tpu.memory_space<vmem>>, %arg3: memref<2x256xf32, #tpu.memory_space<vmem>>) attributes {dimension_semantics = [#tpu.dimension_semantics<parallel>, #tpu.dimension_semantics<arbitrary>], iteration_bounds = array<i64: 1, 1>, scalar_prefetch = 0 : i64, scratch_operands = 0 : i64, tpu.core_type = #tpu.core_type<tc>, window_params = [{transform_indices = @transform_0, window_bounds = array<i64: 2, 4, 256>}, {transform_indices = @transform_1, window_bounds = array<i64: 2, 256>}]} {
    %c0_i32 = arith.constant 0 : i32
    %0 = arith.cmpi eq, %arg1, %c0_i32 : i32
    %1 = arith.extui %0 : i1 to i32
    %c0_i32_0 = arith.constant 0 : i32
    %2 = arith.cmpi ne, %1, %c0_i32_0 : i32
    scf.if %2 {
      %cst_12 = arith.constant 0.000000e+00 : f32
      %22 = vector.broadcast %cst_12 : f32 to vector<2x256xf32>
      %c0_13 = arith.constant 0 : index
      %c0_14 = arith.constant 0 : index
      %23 = vector.load %arg3[%c0_13, %c0_14] : memref<2x256xf32, #tpu.memory_space<vmem>>, vector<2x256xf32>
      tpu.vector_store %arg3[%c0_13, %c0_14], %22 {strides = array<i32>} : memref<2x256xf32, #tpu.memory_space<vmem>>, vector<2x256xf32>,
    } else {
    }
    %c0 = arith.constant 0 : index
    %c0_1 = arith.constant 0 : index
    %c0_2 = arith.constant 0 : index
    %3 = vector.load %arg2[%c0, %c0_1, %c0_2] : memref<2x4x256xf32, #tpu.memory_space<vmem>>, vector<2x4x256xf32>
    %cst = arith.constant dense<0.000000e+00> : vector<2x4xf32>
    %4 = vector.multi_reduction <add>, %3, %cst [2] : vector<2x4x256xf32> to vector<2x4xf32>
    %5 = vector.shape_cast %4 : vector<2x4xf32> to vector<2x4x1xf32>
    %cst_3 = arith.constant 3.906250e-03 : f32
    %6 = vector.broadcast %cst_3 : f32 to vector<2x4x1xf32>
    %7 = arith.mulf %5, %6 : vector<2x4x1xf32>
    %8 = arith.negf %7 : vector<2x4x1xf32>
    %9 = math.exp %8 : vector<2x4x1xf32>
    %cst_4 = arith.constant 1.000000e+00 : f32
    %10 = vector.broadcast %cst_4 : f32 to vector<2x4x1xf32>
    %11 = arith.addf %10, %9 : vector<2x4x1xf32>
    %12 = arith.divf %10, %11 : vector<2x4x1xf32>
    %13 = vector.broadcast %12 : vector<2x4x1xf32> to vector<2x4x256xf32>
    %14 = arith.mulf %3, %13 : vector<2x4x256xf32>
    %cst_5 = arith.constant dense<0.000000e+00> : vector<2x256xf32>
    %15 = vector.multi_reduction <add>, %14, %cst_5 [1] : vector<2x4x256xf32> to vector<2x256xf32>
    %c0_6 = arith.constant 0 : index
    %c0_7 = arith.constant 0 : index
    %16 = vector.load %arg3[%c0_6, %c0_7] : memref<2x256xf32, #tpu.memory_space<vmem>>, vector<2x256xf32>
    %17 = arith.addf %16, %15 : vector<2x256xf32>
    %c0_8 = arith.constant 0 : index
    %c0_9 = arith.constant 0 : index
    %18 = vector.load %arg3[%c0_8, %c0_9] : memref<2x256xf32, #tpu.memory_space<vmem>>, vector<2x256xf32>
    tpu.vector_store %arg3[%c0_8, %c0_9], %17 {strides = array<i32>} : memref<2x256xf32, #tpu.memory_space<vmem>>, vector<2x256xf32>,
    %c0_i32_10 = arith.constant 0 : i32
    %19 = arith.cmpi eq, %arg1, %c0_i32_10 : i32
    %20 = arith.extui %19 : i1 to i32
    %c0_i32_11 = arith.constant 0 : i32
    %21 = arith.cmpi ne, %20, %c0_i32_11 : i32
    scf.if %21 {
      %c0_12 = arith.constant 0 : index
      %c0_13 = arith.constant 0 : index
      %22 = vector.load %arg3[%c0_12, %c0_13] : memref<2x256xf32, #tpu.memory_space<vmem>>, vector<2x256xf32>
      %cst_14 = arith.constant 2.500000e-01 : f32
      %23 = vector.broadcast %cst_14 : f32 to vector<2x256xf32>
      %24 = arith.mulf %22, %23 : vector<2x256xf32>
      %c0_15 = arith.constant 0 : index
      %c0_16 = arith.constant 0 : index
      %25 = vector.load %arg3[%c0_15, %c0_16] : memref<2x256xf32, #tpu.memory_space<vmem>>, vector<2x256xf32>
      tpu.vector_store %arg3[%c0_15, %c0_16], %24 {strides = array<i32>} : memref<2x256xf32, #tpu.memory_space<vmem>>, vector<2x256xf32>,
    } else {
    }
    return
  }
  func.func @transform_0(%arg0: i32, %arg1: i32) -> (i32, i32, i32) {
    %c0_i32 = arith.constant 0 : i32
    %c0_i32_0 = arith.constant 0 : i32
    return %arg0, %arg1, %c0_i32 : i32, i32, i32
  }
  func.func @transform_1(%arg0: i32, %arg1: i32) -> (i32, i32) {
    %c0_i32 = arith.constant 0 : i32
    %c0_i32_0 = arith.constant 0 : i32
    return %arg0, %c0_i32 : i32, i32
  }
}

</mosaic_0001>

<bundles_post_ra>
// kernel: tpu_custom_call.1
= control target key start
LH: loop header
LB: loop body
LE: loop exit
PB: predicated region body
PF: predicated region fallthrough
CT: control target
= control target key end

     0   :  { %6 = vsyncpa [#allocation3], 0  ;;  %s289_s0 = inlined_call_operand.hbm [shape: f32[2,4,256], index: 0, kind: input, shape index: {}]   ;;  %s290_s1 = inlined_call_operand.hbm [shape: f32[2,256], index: 1, kind: output, shape index: {}]  }
   0x1   :  { %7 = vsyncpa [#allocation4], 0  ;;  %s240_s6 = smov [#allocation2]   ;;  %s192_s10 = scalar_lea.hbm %s289_s0, 256 }
   0x2   :  { %s13_s7 = sshll.u32 %s240_s6, 4  ;;  %p193_p0 = scmp.ne.s32.totalorder %s289_s0, %s192_s10  ;;  %s14_s7 = int_to_ptr.vmem [resolvable:$true] %s13_s7 }
   0x3   :  { %p196_p1 = scmp.lt.u32.totalorder %s192_s10, %s289_s0 }
   0x5   :  { %p198_p2 = pnand %p196_p1, %p193_p0 }
   0x7   :  { %201 = shalt.err (!%p198_p2)
}
   0x8   :  { %s202_s15 = scalar_lea.vmem %s14_s7, 256  ;;  %p207_p4 = scmp.lt.s32.totalorder %s14_s7, %s14_s7 }
   0x9   :  { %p203_p3 = scmp.ne.s32.totalorder %s14_s7, %s202_s15  ;;  %p208_p5 = scmp.lt.s32.totalorder %s202_s15, %s202_s15 }
   0xb   :  { %p209_p6 = por %p208_p5, %p207_p4 }
   0xd   :  { %p210_p7 = pnand %p209_p6, %p203_p3 }
   0xf   :  { %213 = shalt.err (!%p210_p7)
}
  0x10   :  { %s241_s16 = smov 128   ;;  %s242_s17 = smov 8  }
  0x11   :  { %19 = dma.hbm_to_vmem [thread:$0]  %s289_s0, 256, %s14_s7, [#allocation3], %s241_s16, %s241_s16, %s242_s17  }
  0x12   :  { %236 = dma.done.wait [#allocation3], 256  }
  0x13   :  { %237 = vsyncadd [#allocation3], 4294967040  ;;  %vm36_vm0 = vcmask 1043456   ;;  %v29_v0 = vld [vmem:[#allocation2 + $0x8] sm:$0xff]  ;;  %v28_v1 = vld [vmem:[#allocation2] sm:$0xff]  ;;  %v243_v10 = vmov 0.0   ;;  %v66_v21 = vlaneseq }
  0x14   :  { %v33_v2 = vcombine.high %v29_v0, %v29_v0  ;;  %v42_v3 = vsel %vm36_vm0, %v29_v0, 0.0  ;;  %v32_v4 = vcombine.high %v28_v1, %v28_v1  ;;  %v37_v6 = vsel %vm36_vm0, %v28_v1, 0.0  ;;  %27 = vst [vmem:[#allocation5] sm:$0xf] %v243_v10  ;;  %s246_s0 = smov [#allocation5]  }
  0x15   :  { %v244_v19 = vmov 839922192   ;;  %v67_v25 = vshrl.u32 %v66_v21, 7  ;;  %v245_v41 = vmov 1983009808   ;;  %vm141_vm1 = vcmask 1041409  }
  0x16   :  { %v43_v5 = vsel %vm36_vm0, %v33_v2, 0.0  ;;  %v38_v7 = vsel %vm36_vm0, %v32_v4, 0.0  ;;  %v64_v20 = vunpack.c.l.s4 %v244_v19  ;;  %v122_v42 = vunpack.c.l.s4 %v245_v41  ;;  %s164_s20 = sshll.u32 %s246_s0, 4  ;;  %s165_s20 = int_to_ptr.vmem [resolvable:$true] %s164_s20 }
  0x17   :  { %v44_v8 = vadd.f32 %v43_v5, %v42_v3  ;;  %v39_v9 = vadd.f32 %v38_v7, %v37_v6  ;;  %vm143_vm2 = vcmask 1043459   ;;  %vm145_vm3 = vcmask 1045509   ;;  %s214_s21 = scalar_lea.vmem %s165_s20, 64  ;;  %p219_p9 = scmp.lt.s32.totalorder %s165_s20, %s165_s20 }
  0x18   :  { %v65_v24 = vunpack.c.0.s8 %v64_v20  ;;  %v123_v51 = vunpack.c.0.s8 %v122_v42  ;;  %vm147_vm4 = vcmask 1047559   ;;  %p215_p8 = scmp.ne.s32.totalorder %s165_s20, %s214_s21  ;;  %p220_p10 = scmp.lt.s32.totalorder %s214_s21, %s214_s21 }
  0x19   :  { %45 = vadd.xlane.f32.xlu0 %v44_v8 }
  0x1a   :  { %v68_v26 = vsub.s32 %v65_v24, %v67_v25  ;;  %v126_v59 = vsub.s32 %v123_v51, %v67_v25  ;;  %p221_p11 = por %p220_p10, %p219_p9 }
  0x1c   :  { %p222_p12 = pnand %p221_p11, %p215_p8 }
  0x1d   :  { %40 = vadd.xlane.f32.xlu0 %v39_v9  ;;  %v115_v9 = vld [vmem:[#allocation5] sm:$0xf] }
  0xa6   :  { %v46_v11 = vpop.xlane.xlu0 %45 }
  0xa7   :  { %v174_v12 = vmul.f32 -0.00390625, %v46_v11 }
  0xa9   :  { %v53_v13 = vmul.f32 1.442695, %v174_v12 }
  0xaa   :  { %v41_v14 = vpop.xlane.xlu0 %40 }
  0xab   :  { %184 = vpow2.f32 %v53_v13  ;;  %v173_v15 = vmul.f32 -0.00390625, %v41_v14 }
  0xad   :  { %v51_v16 = vmul.f32 1.442695, %v173_v15 }
  0xaf   :  { %186 = vpow2.f32 %v51_v16 }
  0xb5   :  { %v185_v17 = vpop.eup %184 }
  0xb6   :  { %v56_v18 = vadd.f32 1.0, %v185_v17 }
  0xb8   :  { %188 = vrcp.f32 %v56_v18 }
  0xb9   :  { %v187_v22 = vpop.eup %186 }
  0xba   :  { %v55_v23 = vadd.f32 1.0, %v187_v22 }
  0xbc   :  { %190 = vrcp.f32 %v55_v23 }
  0xc2   :  { %v189_v27 = vpop.eup %188 }
  0xc3   :  { %v76_v28 = vrot.slane %v189_v27, %v68_v26 }
  0xc5   :  { %v80_v29 = vmul.f32 %v76_v28, %v29_v0 }
  0xc6   :  { %v191_v30 = vpop.eup %190 }
  0xc7   :  { %v84_v31 = vcombine.high %v80_v29, %v80_v29  ;;  %v101_v32 = vsel %vm36_vm0, %v80_v29, 0.0  ;;  %v69_v33 = vrot.slane %v191_v30, %v68_v26 }
  0xc8   :  { %v102_v34 = vrot.slane %v101_v32, 4 }
  0xc9   :  { %v108_v35 = vsel %vm36_vm0, %v84_v31, 0.0  ;;  %v79_v36 = vmul.f32 %v69_v33, %v28_v1 }
  0xca   :  { %v103_v37 = vadd.f32 %v102_v34, %v101_v32  ;;  %v109_v38 = vrot.slane %v108_v35, 4 }
  0xcb   :  { %v83_v39 = vcombine.high %v79_v36, %v79_v36  ;;  %v87_v40 = vsel %vm36_vm0, %v79_v36, 0.0 }
  0xcc   :  { %v104_v43 = vrot.slane %v103_v37, 2  ;;  %v110_v44 = vadd.f32 %v109_v38, %v108_v35  ;;  %v88_v45 = vrot.slane %v87_v40, 4 }
  0xcd   :  { %v94_v46 = vsel %vm36_vm0, %v83_v39, 0.0 }
  0xce   :  { %v105_v47 = vadd.f32 %v104_v43, %v103_v37  ;;  %v111_v48 = vrot.slane %v110_v44, 2  ;;  %v89_v49 = vadd.f32 %v88_v45, %v87_v40  ;;  %v95_v50 = vrot.slane %v94_v46, 4 }
  0xd0   :  { %v106_v52 = vrot.slane %v105_v47, 1  ;;  %v112_v53 = vadd.f32 %v111_v48, %v110_v44  ;;  %v90_v54 = vrot.slane %v89_v49, 2  ;;  %v96_v55 = vadd.f32 %v95_v50, %v94_v46 }
  0xd2   :  { %v91_v56 = vadd.f32 %v90_v54, %v89_v49  ;;  %v97_v57 = vrot.slane %v96_v55, 2  ;;  %v113_v58 = vrot.slane %v112_v53, 1  ;;  %v107_v62 = vadd.f32 %v106_v52, %v105_v47 }
  0xd4   :  { %v92_v60 = vrot.slane %v91_v56, 1  ;;  %v98_v61 = vadd.f32 %v97_v57, %v96_v55  ;;  %v114_v63 = vadd.f32 %v113_v58, %v112_v53 }
  0xd6   :  { %v99_v0 = vrot.slane %v98_v61, 1  ;;  %v128_v1 = vcombine.low %v107_v62, %v114_v63  ;;  %v93_v2 = vadd.f32 %v92_v60, %v91_v56 }
  0xd8   :  { %v100_v3 = vadd.f32 %v99_v0, %v98_v61  ;;  %v135_v4 = vrot.slane %v128_v1, %v126_v59 }
  0xda   :  { %v120_v5 = vcombine.low %v93_v2, %v100_v3  ;;  %v140_v7 = vrot.slane %v135_v4, 7 }
  0xdc   :  { %v127_v6 = vrot.slane %v120_v5, %v126_v59 }
  0xde   :  { %v142_v8 = vsel %vm141_vm1, %v140_v7, %v127_v6 }
  0xdf   :  { %v144_v10 = vsel %vm143_vm2, %v140_v7, %v142_v8 }
  0xe0   :  { %v146_v11 = vsel %vm145_vm3, %v140_v7, %v144_v10 }
  0xe1   :  { %v148_v12 = vsel %vm147_vm4, %v140_v7, %v146_v11 }
  0xe2   :  { %v150_v13 = vadd.f32 %v148_v12, %v115_v9 }
  0xe4   :  { %151 = vst [vmem:[#allocation5] sm:$0xf] %v150_v13 }
  0xeb   :  { %v155_v14 = vld [vmem:[#allocation5] sm:$0xf] }
  0xec   :  { %v156_v15 = vmul.f32 0.25, %v155_v14 }
  0xee   :  { %157 = vst [vmem:[#allocation5] sm:$0xf] %v156_v15 }
  0xef   :  { %225 = shalt.err (!%p222_p12)
}
  0xf0   :  { %s226_s24 = scalar_lea.hbm %s290_s1, 64 }
  0xf1   :  { %p227_p13 = scmp.ne.s32.totalorder %s290_s1, %s226_s24  ;;  %p230_p0 = scmp.lt.u32.totalorder %s226_s24, %s290_s1 }
  0xf3   :  { %p232_p1 = pnand %p230_p0, %p227_p13 }
  0xf5   :  { %235 = shalt.err (!%p232_p1)
}
  0xf6   :  { %167 = dma.vmem_to_hbm [thread:$0]  %s165_s20, 64, %s290_s1, [#allocation4]  }
  0xf7   :  { %238 = dma.done.wait [#allocation4], 64  }
  0xf8   :  { %239 = vsyncadd [#allocation4], 4294967232 }
  0xf9   :  { %171 = vsyncpa [#allocation3], 1 }
  0xfa   :  { %172 = vsyncpa [#allocation4], 1 }

</bundles_post_ra>
